<compile_context>
chip_gen: v6e
topology: v6e:2x2x1
jax: 0.10.0
libtpu: 0.0.40
codegen_flags: <defaults>
</compile_context>

<pallas_src>
import functools

import jax
import jax.numpy as jnp
from jax.experimental import pallas as pl
from jax.experimental.pallas import tpu as pltpu

EPS = 1e-5                         # BatchNorm eps
CP = 4                             # relative-xyz channels padded 3 -> 4


# ---------------------------------------------------------------------------
# Generation-aware VMEM sizing / tile selection
# ---------------------------------------------------------------------------
def _vmem_capacity_bytes():
    try:
        cap = getattr(pltpu.get_tpu_info(), "vmem_capacity_bytes", None)
        if cap:
            return int(cap)
    except Exception:
        pass
    return 64 * 1024 * 1024        # conservative default (v7x per-core VMEM)


_VMEM_CAP = _vmem_capacity_bytes()
_VMEM_LIMIT = min(int(0.78 * _VMEM_CAP), 100 * 1024 * 1024)
_TILE_BUDGET = int(0.60 * _VMEM_LIMIT)          # headroom: weights + compiler scratch
_BIG_VMEM = _VMEM_CAP >= 96 * 1024 * 1024       # v5e / v6e (128 MiB)


def _attn_row_bytes(K, C):
    # double-buffered DMA blocks + ~8 live (K, C) f32 intermediates per point
    blocks = 2 * (K * 2 * C * 2      # fused key|value (bf16)
                  + K * CP * 2       # relative xyz (bf16, padded to 4)
                  + C * 2            # query (bf16)
                  + C * 4)           # output (f32)
    live = 8 * K * C * 4
    return blocks + live


def _qkv_row_bytes(c_in, C):
    return 2 * (c_in * 4 + 3 * C * 2) + 3 * C * 4


def _pick_tile(n, row_bytes, budget, cap, other_grid, min_programs=2):
    """Largest tile dividing n that fits the VMEM budget and (if possible)
    keeps >= min_programs grid steps so both v7x TensorCores get work."""
    cands = [t for t in (2048, 1024, 512, 256, 128, 64, 32, 16, 8)
             if t <= cap and n % t == 0 and t * row_bytes <= budget]
    for t in cands:
        if other_grid * (n // t) >= min_programs:
            return t
    return cands[0] if cands else n


# ---------------------------------------------------------------------------
# Kernel 1: fused Q/K/V 1x1-conv projection (one MXU matmul per (b, n) tile)
# ---------------------------------------------------------------------------
def _qkv_kernel(C, x_ref, w_ref, b_ref, q_ref, kv_ref):
    x = x_ref[0]                                                 # (T, Cin) f32
    y = jnp.dot(x, w_ref[...], preferred_element_type=jnp.float32) + b_ref[...]
    # NOTE: for C < 128 this column split is a sub-vreg lane select; for real
    # channel widths make C a multiple of 128 so both stores are lane-aligned.
    q_ref[0] = y[:, :C].astype(q_ref.dtype)                      # query (bf16)
    kv_ref[0] = y[:, C:].astype(kv_ref.dtype)                    # key|value (bf16)


def qkv_proj(x, wqkv, bqkv, c_out, tile_n):
    B, N, Cin = x.shape
    nt = N // tile_n
    kernel = functools.partial(_qkv_kernel, c_out)
    return pl.pallas_call(
        kernel,
        out_shape=(jax.ShapeDtypeStruct((B, N, c_out), jnp.bfloat16),
                   jax.ShapeDtypeStruct((B, N, 2 * c_out), jnp.bfloat16)),
        grid=(B, nt),
        in_specs=[
            pl.BlockSpec((1, tile_n, Cin), lambda b, n: (b, n, 0)),
            pl.BlockSpec(wqkv.shape, lambda b, n: (0, 0)),
            pl.BlockSpec(bqkv.shape, lambda b, n: (0, 0)),
        ],
        out_specs=(
            pl.BlockSpec((1, tile_n, c_out), lambda b, n: (b, n, 0)),
            pl.BlockSpec((1, tile_n, 2 * c_out), lambda b, n: (b, n, 0)),
        ),
        compiler_params=pltpu.CompilerParams(
            dimension_semantics=("parallel", "parallel"),
            vmem_limit_bytes=_VMEM_LIMIT),
    )(x, wqkv, bqkv)


# ---------------------------------------------------------------------------
# Kernel 2: pos-enc MLP + attention MLP + softmax + weighted sum, tiled over N
# ---------------------------------------------------------------------------
def _attn_kernel(tile_n, K, C,
                 q_ref, kv_ref, rel_ref,
                 w1_ref, b1_ref, w2_ref, b2_ref,
                 bE_ref, wa1_ref, bA_ref, wa2_ref, ba2_ref,
                 y_ref):
    R = tile_n * K
    q = q_ref[0].astype(jnp.float32)                # (T, C), bnE-scaled
    kv = kv_ref[0]                                  # (T, K, 2C) bf16 (kept packed)
    nk = kv[:, :, :C].astype(jnp.float32)           # grouped key (bnE-scaled)
    rel = rel_ref[0].astype(jnp.float32)            # (R, CP) rel-xyz (zero padded)

    # to_pos_enc: Conv(3,3,no bias)+BN(scale folded into w1) -> ReLU -> Conv(3,C)
    h = jnp.maximum(
        jnp.dot(rel, w1_ref[...], preferred_element_type=jnp.float32)
        + b1_ref[...], 0.0)
    nr = jnp.dot(h, w2_ref[...], preferred_element_type=jnp.float32) + b2_ref[...]

    # energy = q - grouped_key + pos_enc (all three already carry the bnE scale)
    # (T,K,C) <-> (R,C) reshapes are layout-preserving for K % 8 == 0.
    e = (q[:, None, :] - nk).reshape(R, C) + nr

    # to_attn: shift+ReLU -> Conv(no bias, bnA scale folded) -> shift+ReLU -> Conv
    a = jnp.maximum(e + bE_ref[...], 0.0)
    a = jnp.dot(a, wa1_ref[...], preferred_element_type=jnp.float32)
    a = jnp.maximum(a + bA_ref[...], 0.0)
    a = jnp.dot(a, wa2_ref[...], preferred_element_type=jnp.float32) + ba2_ref[...]
    a = a.reshape(tile_n, K, C)

    # softmax over the K neighbors (torch: dim=-1 of (B, C, N, K))
    a = a - jnp.max(a, axis=1, keepdims=True)
    a_exp = jnp.exp(a)
    inv = pl.reciprocal(jnp.sum(a_exp, axis=1, keepdims=True), approx=True)
    attn = a_exp * inv

    # grouped value is cast from bf16 only here (f32 accumulate of the sum)
    nv = kv[:, :, C:].astype(jnp.float32)
    y_ref[0] = jnp.sum(nv * attn, axis=1).astype(y_ref.dtype)     # (T, C)


def attn_aggregate(q, n_kv, rel, params, tile_n, K, C):
    B, N, _ = q.shape
    nt = N // tile_n

    def wspec(arr):
        nd = arr.ndim
        return pl.BlockSpec(arr.shape, lambda b, n, _nd=nd: (0,) * _nd)

    weights = (params["w1p"], params["b1p"], params["w2p"], params["b2p"],
               params["bEp"], params["wa1p"], params["bAp"],
               params["wa2p"], params["ba2p"])

    # Triple-buffer the fat gathered key|value stream where VMEM is plentiful
    # (v5e/v6e, 128 MiB); keep depth 2 on v7x (64 MiB/TC).
    kv_shape = (1, tile_n, K, 2 * C)
    kv_imap = lambda b, n: (b, n, 0, 0)
    kv_spec = pl.BlockSpec(kv_shape, kv_imap)
    if _BIG_VMEM:
        try:
            kv_spec = pl.BlockSpec(kv_shape, kv_imap,
                                   pipeline_mode=pl.Buffered(3))
        except TypeError:
            kv_spec = pl.BlockSpec(kv_shape, kv_imap)

    kernel = functools.partial(_attn_kernel, tile_n, K, C)
    return pl.pallas_call(
        kernel,
        out_shape=jax.ShapeDtypeStruct((B, N, C), jnp.float32),
        grid=(B, nt),
        in_specs=[
            pl.BlockSpec((1, tile_n, C), lambda b, n: (b, n, 0)),        # q
            kv_spec,                                                     # k|v
            pl.BlockSpec((1, tile_n * K, CP), lambda b, n: (b, n, 0)),   # rel
        ] + [wspec(w) for w in weights],
        out_specs=pl.BlockSpec((1, tile_n, C), lambda b, n: (b, n, 0)),
        compiler_params=pltpu.CompilerParams(
            dimension_semantics=("parallel", "parallel"),
            vmem_limit_bytes=_VMEM_LIMIT),
    )(q, n_kv, rel, *weights)


# ---------------------------------------------------------------------------
# Full layer (glue + kernels)
# ---------------------------------------------------------------------------
def point_transformer_layer(p, x, params, num_neighbors=16,
                            tile_n=None, qkv_tile_n=None):
    """p: (B, N, 3) float32 points, x: (B, N, C_in) float32 features."""
    B, N, _ = p.shape
    K = num_neighbors
    C = params["wqkv"].shape[1] // 3
    Cin = x.shape[-1]

    if qkv_tile_n is None:       # qkv is pure mem-bound: biggest tile possible
        qkv_tile_n = _pick_tile(N, _qkv_row_bytes(Cin, C), _TILE_BUDGET,
                                cap=2048, other_grid=B)
    if tile_n is None:
        cap = 1024 if _BIG_VMEM else 512
        tile_n = _pick_tile(N, _attn_row_bytes(K, C), _TILE_BUDGET,
                            cap=cap, other_grid=B)
    assert N % tile_n == 0 and N % qkv_tile_n == 0

    # 1) fused q/k/v 1x1-conv projection (Pallas, bf16 outputs).
    q, kv = qkv_proj(x, params["wqkv"], params["bqkv"], C, qkv_tile_n)

    # 2) kNN grouping (pointops.QueryAndGroup equivalent) — plain JAX glue.
    #    d^2 = ||pi||^2 + ||pj||^2 - 2 pi.pj (one MXU matmul, no (B,N,N,3)
    #    broadcast).  TODO(synk): use jax.lax.approx_max_k / blocked kNN for
    #    large N; the data-dependent row gather stays in XLA (see header).
    sq = jnp.sum(p * p, axis=-1)                                    # (B, N)
    d2 = sq[:, :, None] + sq[:, None, :] - 2.0 * jnp.einsum(
        "bnd,bmd->bnm", p, p)
    _, idx = jax.lax.top_k(-d2, K)                                  # (B, N, K)

    take = jax.vmap(lambda feat_b, idx_b: jnp.take(feat_b, idx_b, axis=0))
    n_kv = take(kv, idx)                                            # (B,N,K,2C) bf16
    rel = take(p, idx) - p[:, :, None, :]                           # neighbor-center
    rel = jnp.concatenate(
        [rel, jnp.zeros((B, N, K, 1), rel.dtype)], axis=-1)         # pad 3 -> 4
    rel = rel.reshape(B, N * K, CP).astype(jnp.bfloat16)

    # 3) pos-enc MLP + attention MLP + softmax + weighted sum (Pallas).
    y = attn_aggregate(q, n_kv, rel, params, tile_n, K, C)
    return [p, y]


# ---------------------------------------------------------------------------
# Deterministic parameters (torch-equivalent) + host-side BN-scale folding
# ---------------------------------------------------------------------------
def _bn_fold(gamma, beta, mean, var):
    scale = gamma / jnp.sqrt(var + EPS)
    shift = beta - mean * scale
    return scale, shift


def init_raw_params(key, c_in, c_out):
    """Torch-module-equivalent parameters (eval-mode BN running stats)."""
    ks = list(jax.random.split(key, 32))
    nrm = lambda k, shp: 0.1 * jax.random.normal(k, shp, jnp.float32)
    pos = lambda k, shp: jax.random.uniform(k, shp, jnp.float32, 0.5, 1.5)
    return {
        # to_query / to_key / to_value (Conv1d k=1), stored as (C_in, C_out).
        "wq": nrm(ks[0], (c_in, c_out)), "bq": nrm(ks[1], (c_out,)),
        "wk": nrm(ks[2], (c_in, c_out)), "bk": nrm(ks[3], (c_out,)),
        "wv": nrm(ks[4], (c_in, c_out)), "bv": nrm(ks[5], (c_out,)),
        # to_pos_enc: Conv2d(3,3,no bias) -> BN(3) -> ReLU -> Conv2d(3,C)
        "w1": nrm(ks[6], (3, 3)),
        "bn1": (pos(ks[7], (3,)), nrm(ks[8], (3,)),
                nrm(ks[9], (3,)), pos(ks[10], (3,))),        # gamma,beta,mean,var
        "w2": nrm(ks[11], (3, c_out)), "b2": nrm(ks[12], (c_out,)),
        # to_attn: BN(C) -> ReLU -> Conv(C,C,no bias) -> BN(C) -> ReLU -> Conv(C,C)
        "bnE": (pos(ks[13], (c_out,)), nrm(ks[14], (c_out,)),
                nrm(ks[15], (c_out,)), pos(ks[16], (c_out,))),
        "wa1": nrm(ks[17], (c_out, c_out)),
        "bnA": (pos(ks[18], (c_out,)), nrm(ks[19], (c_out,)),
                nrm(ks[20], (c_out,)), pos(ks[21], (c_out,))),
        "wa2": nrm(ks[22], (c_out, c_out)), "ba2": nrm(ks[23], (c_out,)),
    }


def fold_params(raw):
    """Fold eval-mode BN scales into adjacent 1x1-conv weights (kernel-ready)."""
    c_out = raw["wq"].shape[1]
    sE, shE = _bn_fold(*raw["bnE"])
    s1, sh1 = _bn_fold(*raw["bn1"])
    sA, shA = _bn_fold(*raw["bnA"])

    # bnE distributes over energy = q - n_k + n_r: scale q, k and the pos-enc
    # output columns; v stays unscaled.
    wq, bq = raw["wq"] * sE[None, :], raw["bq"] * sE
    wk, bk = raw["wk"] * sE[None, :], raw["bk"] * sE
    return {
        "wqkv": jnp.concatenate([wq, wk, raw["wv"]], axis=1),       # (Cin, 3C)
        "bqkv": jnp.concatenate([bq, bk, raw["bv"]])[None, :],      # (1, 3C)
        # to_pos_enc (padded 3 -> CP channels; padded rows/cols are zero)
        "w1p": jnp.zeros((CP, CP), jnp.float32).at[:3, :3].set(
            raw["w1"] * s1[None, :]),
        "b1p": jnp.zeros((1, CP), jnp.float32).at[0, :3].set(sh1),
        "w2p": jnp.zeros((CP, c_out), jnp.float32).at[:3, :].set(
            raw["w2"] * sE[None, :]),
        "b2p": (raw["b2"] * sE)[None, :],
        # to_attn (only shifts remain; scales folded into wa1 / the energy)
        "bEp": shE[None, :],
        "wa1p": raw["wa1"] * sA[None, :],
        "bAp": shA[None, :],
        "wa2p": raw["wa2"],
        "ba2p": raw["ba2"][None, :],
    }


# ---------------------------------------------------------------------------
if __name__ == "__main__":
    key = jax.random.PRNGKey(0)
    kp, kx, kw = jax.random.split(key, 3)

    B, N, C_in, C_out, K = 2, 128, 16, 16, 16
    points = jax.random.normal(kp, (B, N, 3), jnp.float32)
    feats = jax.random.normal(kx, (B, N, C_in), jnp.float32)
    params = fold_params(init_raw_params(kw, C_in, C_out))

    p_out, y = point_transformer_layer(points, feats, params, num_neighbors=K)
    jax.block_until_ready(y)
    assert y.shape == (B, N, C_out)
    assert bool(jnp.all(jnp.isfinite(y)))
    print("KERNEL_OK")
</pallas_src>

<mosaic_0001>
module attributes {stable_mosaic.version = 11 : i64} {
  func.func @_qkv_kernel(%arg0: i32, %arg1: i32, %arg2: memref<1x128x16xf32, #tpu.memory_space<vmem>>, %arg3: memref<16x48xf32, #tpu.memory_space<vmem>>, %arg4: memref<1x48xf32, #tpu.memory_space<vmem>>, %arg5: memref<1x128x16xbf16, #tpu.memory_space<vmem>>, %arg6: memref<1x128x32xbf16, #tpu.memory_space<vmem>>) attributes {dimension_semantics = [#tpu.dimension_semantics<parallel>, #tpu.dimension_semantics<parallel>], iteration_bounds = array<i64: 2, 1>, scalar_prefetch = 0 : i64, scratch_operands = 0 : i64, tpu.core_type = #tpu.core_type<tc>, window_params = [{transform_indices = @transform_0, window_bounds = array<i64: 1, 128, 16>}, {pipeline_mode = #tpu.pipeline_mode<synchronous>, transform_indices = @transform_1, window_bounds = array<i64: 16, 48>}, {pipeline_mode = #tpu.pipeline_mode<synchronous>, transform_indices = @transform_2, window_bounds = array<i64: 1, 48>}, {transform_indices = @transform_3, window_bounds = array<i64: 1, 128, 16>}, {transform_indices = @transform_4, window_bounds = array<i64: 1, 128, 32>}]} {
    %c0 = arith.constant 0 : index
    %c0_0 = arith.constant 0 : index
    %c0_1 = arith.constant 0 : index
    %0 = vector.load %arg2[%c0, %c0_0, %c0_1] : memref<1x128x16xf32, #tpu.memory_space<vmem>>, vector<1x128x16xf32>
    %1 = vector.shape_cast %0 : vector<1x128x16xf32> to vector<128x16xf32>
    %c0_2 = arith.constant 0 : index
    %c0_3 = arith.constant 0 : index
    %2 = vector.load %arg3[%c0_2, %c0_3] : memref<16x48xf32, #tpu.memory_space<vmem>>, vector<16x48xf32>
    %cst = arith.constant dense<0.000000e+00> : vector<128x48xf32>
    %3 = tpu.matmul %1, %2, %cst {dimension_numbers = #tpu.dot_dimension_numbers<[1], [0], [0], [1], [0, 0, 1, 1], [], []>} : vector<128x16xf32>, vector<16x48xf32>, vector<128x48xf32> -> vector<128x48xf32>
    %c0_4 = arith.constant 0 : index
    %c0_5 = arith.constant 0 : index
    %4 = vector.load %arg4[%c0_4, %c0_5] : memref<1x48xf32, #tpu.memory_space<vmem>>, vector<1x48xf32>
    %5 = vector.broadcast %4 : vector<1x48xf32> to vector<128x48xf32>
    %6 = arith.addf %3, %5 : vector<128x48xf32>
    %7 = vector.extract_strided_slice %6 {offsets = [0, 0], sizes = [128, 16], strides = [1, 1]} : vector<128x48xf32> to vector<128x16xf32>
    %8 = arith.truncf %7 : vector<128x16xf32> to vector<128x16xbf16>
    %c0_6 = arith.constant 0 : index
    %c0_7 = arith.constant 0 : index
    %c0_8 = arith.constant 0 : index
    %9 = vector.load %arg5[%c0_6, %c0_7, %c0_8] : memref<1x128x16xbf16, #tpu.memory_space<vmem>>, vector<1x128x16xbf16>
    %10 = vector.shape_cast %9 : vector<1x128x16xbf16> to vector<128x16xbf16>
    %11 = vector.shape_cast %8 : vector<128x16xbf16> to vector<1x128x16xbf16>
    tpu.vector_store %arg5[%c0_6, %c0_7, %c0_8], %11 {strides = array<i32>} : memref<1x128x16xbf16, #tpu.memory_space<vmem>>, vector<1x128x16xbf16>,
    %12 = vector.extract_strided_slice %6 {offsets = [0, 16], sizes = [128, 32], strides = [1, 1]} : vector<128x48xf32> to vector<128x32xf32>
    %13 = arith.truncf %12 : vector<128x32xf32> to vector<128x32xbf16>
    %c0_9 = arith.constant 0 : index
    %c0_10 = arith.constant 0 : index
    %c0_11 = arith.constant 0 : index
    %14 = vector.load %arg6[%c0_9, %c0_10, %c0_11] : memref<1x128x32xbf16, #tpu.memory_space<vmem>>, vector<1x128x32xbf16>
    %15 = vector.shape_cast %14 : vector<1x128x32xbf16> to vector<128x32xbf16>
    %16 = vector.shape_cast %13 : vector<128x32xbf16> to vector<1x128x32xbf16>
    tpu.vector_store %arg6[%c0_9, %c0_10, %c0_11], %16 {strides = array<i32>} : memref<1x128x32xbf16, #tpu.memory_space<vmem>>, vector<1x128x32xbf16>,
    return
  }
  func.func @transform_0(%arg0: i32, %arg1: i32) -> (i32, i32, i32) {
    %c0_i32 = arith.constant 0 : i32
    %c0_i32_0 = arith.constant 0 : i32
    return %arg0, %arg1, %c0_i32 : i32, i32, i32
  }
  func.func @transform_1(%arg0: i32, %arg1: i32) -> (i32, i32) {
    %c0_i32 = arith.constant 0 : i32
    %c0_i32_0 = arith.constant 0 : i32
    %c0_i32_1 = arith.constant 0 : i32
    return %c0_i32, %c0_i32_0 : i32, i32
  }
  func.func @transform_2(%arg0: i32, %arg1: i32) -> (i32, i32) {
    %c0_i32 = arith.constant 0 : i32
    %c0_i32_0 = arith.constant 0 : i32
    %c0_i32_1 = arith.constant 0 : i32
    return %c0_i32, %c0_i32_0 : i32, i32
  }
  func.func @transform_3(%arg0: i32, %arg1: i32) -> (i32, i32, i32) {
    %c0_i32 = arith.constant 0 : i32
    %c0_i32_0 = arith.constant 0 : i32
    return %arg0, %arg1, %c0_i32 : i32, i32, i32
  }
  func.func @transform_4(%arg0: i32, %arg1: i32) -> (i32, i32, i32) {
    %c0_i32 = arith.constant 0 : i32
    %c0_i32_0 = arith.constant 0 : i32
    return %arg0, %arg1, %c0_i32 : i32, i32, i32
  }
}

</mosaic_0001>

<bundles_post_ra>
// kernel: tpu_custom_call.1
= control target key start
LH: loop header
LB: loop body
LE: loop exit
PB: predicated region body
PF: predicated region fallthrough
CT: control target
= control target key end

     0   :  { %s953_s15 = smov 0   ;;  %s955_s16 = smov 0   ;;  %s1124_s0 = inlined_call_operand.vmem [shape: f32[2,128,16], index: 0, kind: input, shape index: {}]   ;;  %s1125_s1 = inlined_call_operand.vmem [shape: f32[16,48], index: 1, kind: input, shape index: {}]   ;;  %s1126_s2 = inlined_call_operand.vmem [shape: f32[1,48], index: 2, kind: input, shape index: {}]   ;;  %s1127_s3 = inlined_call_operand.vmem [shape: bf16[2,128,16], index: 3, kind: output, shape index: {0}]   ;;  %s1128_s4 = inlined_call_operand.vmem [shape: bf16[2,128,32], index: 4, kind: output, shape index: {1}]  }
   0x1   :  { %s957_s17 = smov 0  }
   0x2 LB: > { %s27_s18 = sadd.s32 1, %s921_s16  ;;  %p767_p0 = scmp.ge.s32.totalorder %s925_s17, 1  ;;  %s925_s17 = sphi %s957_s17, %s15_s17   ;;  %s921_s16 = sphi %s955_s16, %s1130_s16   ;;  %s917_s15 = sphi %s953_s15, %s1129_s15  }
   0x3   : > { %p29_p1 = scmp.ge.s32.totalorder %s27_s18, 2  ;;  %p188_p2 = scmp.lt.s32.totalorder %s925_s17, 3 }
   0x5   : > { %s1132_s18 = smov (%p29_p1, %s27_s18), 0  ;;  %p189_p3 = pnand %p767_p0, %p188_p2 }
   0x6   : > { %p232_p4 = scmp.lt.s32.totalorder (!%p189_p3), %s917_s15, 1  ;;  %s927_s7 = smov (!%p189_p3), 112  }
   0x7   : > { %192 = sbr.rel (%p189_p3) target bundleno = 360 (0x168), region = 32 }
   0xc   : > { %v278_v0 = vld [vmem:[%s1125_s1 + $0x8] sm:$0xff]  ;;  %v277_v1 = vld [vmem:[%s1125_s1] sm:$0xff]  ;;  %s1134_s15 = smov (!%p232_p4, %s917_s15), 1  ;;  %vm286_vm0 = vcmask 130048   ;;  %vm544_vm1 = vcmask 125952   ;;  %vm609_vm2 = vcmask 257024  }
   0xd   : > { %846 = vmatprep.subr.mxu0 %v278_v0  ;;  %874 = vmatprep.subr.mxu1 %v278_v0  ;;  %s809_s23 = sshll.u32 %s1134_s15, 7  ;;  %v1002_v18 = vld [vmem:[%s1126_s2] ss:$0 sm:$0xff]  ;;  %s810_s29 = sshll.u32 %s1134_s15, 6 }
   0xe   : > { %847 = vmatpush3.msra.mxu0 %v278_v0  ;;  %876 = vmatpush3.msra.mxu1 %v278_v0  ;;  %s239_s26 = scalar_lea.vmem %s1124_s0, %s809_s23  ;;  %s1012_s6 = scalar_lea.vmem %s1127_s3, %s810_s29 }
   0xf   : > { %848 = vmatprep.subr.mxu0 %v277_v1  ;;  %875 = vmatprep.subr.mxu1 %v277_v1  ;;  %v261_v2 = vld [vmem:[%s239_s26] sm:$0xff]  ;;  %v262_v4 = vld [vmem:[%s239_s26 + $0x8] sm:$0xff]  ;;  %v263_v6 = vld [vmem:[%s239_s26 + $0x10] sm:$0xff]  ;;  %s1081_s10 = scalar_lea.vmem %s1128_s4, %s810_s29 }
  0x10   : > { %849 = vmatpush3.msra.mxu0 %v277_v1  ;;  %877 = vmatpush3.msra.mxu1 %v277_v1  ;;  %v269_v3 = vld [vmem:[%s239_s26 + $0x40] sm:$0xff]  ;;  %v270_v5 = vld [vmem:[%s239_s26 + $0x48] sm:$0xff]  ;;  %v271_v7 = vld [vmem:[%s239_s26 + $0x50] sm:$0xff] }
  0x11   : > { %850 = vmatprep.mubr.msk.f32.mxu0 %vm286_vm0, %v261_v2  ;;  %862 = vmatprep.mubr.msk.f32.mxu1 %vm286_vm0, %v269_v3  ;;  %v264_v8 = vld [vmem:[%s239_s26 + $0x18] sm:$0xff]  ;;  %v265_v10 = vld [vmem:[%s239_s26 + $0x20] sm:$0xff]  ;;  %v266_v12 = vld [vmem:[%s239_s26 + $0x28] sm:$0xff] }
  0x12   : > { %851 = vmatmul.mubr.msk.f32.vlgmr.msra.gmra.mxu0 %vm286_vm0, %v262_v4  ;;  %863 = vmatmul.mubr.msk.f32.vlgmr.msra.gmra.mxu1 %vm286_vm0, %v270_v5  ;;  %v272_v9 = vld [vmem:[%s239_s26 + $0x58] sm:$0xff]  ;;  %v273_v11 = vld [vmem:[%s239_s26 + $0x60] sm:$0xff]  ;;  %v274_v13 = vld [vmem:[%s239_s26 + $0x68] sm:$0xff] }
  0x13   : > { %853 = vmatprep.mubr.msk.f32.mxu0 %vm286_vm0, %v263_v6  ;;  %865 = vmatprep.mubr.msk.f32.mxu1 %vm286_vm0, %v271_v7  ;;  %v267_v14 = vld [vmem:[%s239_s26 + $0x30] sm:$0xff]  ;;  %v268_v16 = vld [vmem:[%s239_s26 + $0x38] sm:$0xff] }
  0x14   : > { %v275_v15 = vld [vmem:[%s239_s26 + $0x70] sm:$0xff]  ;;  %v276_v17 = vld [vmem:[%s239_s26 + $0x78] sm:$0xff] }
  0x16   : > { %854 = vmatmul.mubr.msk.f32.gmra.mxu0 %vm286_vm0, %v264_v8  ;;  %866 = vmatmul.mubr.msk.f32.gmra.mxu1 %vm286_vm0, %v272_v9 }
  0x17   : > { %856 = vmatprep.mubr.msk.f32.mxu0 %vm286_vm0, %v265_v10  ;;  %868 = vmatprep.mubr.msk.f32.mxu1 %vm286_vm0, %v273_v11 }
  0x1a   : > { %857 = vmatmul.mubr.msk.f32.gmra.mxu0 %vm286_vm0, %v266_v12  ;;  %869 = vmatmul.mubr.msk.f32.gmra.mxu1 %vm286_vm0, %v274_v13 }
  0x1b   : > { %859 = vmatprep.mubr.msk.f32.mxu0 %vm286_vm0, %v267_v14  ;;  %871 = vmatprep.mubr.msk.f32.mxu1 %vm286_vm0, %v275_v15 }
  0x1e   : > { %860 = vmatmul.mubr.msk.f32.gmra.mxu0 %vm286_vm0, %v268_v16  ;;  %872 = vmatmul.mubr.msk.f32.gmra.mxu1 %vm286_vm0, %v276_v17 }
  0xd2   : > { %v852_v19 = vpop.f32.mrf.mxu0  ;;  %v864_v20 = vpop.f32.mrf.mxu1 }
  0xd3   : > { %v407_v21 = vadd.f32 %v852_v19, %v1002_v18  ;;  %v447_v22 = vadd.f32 %v864_v20, %v1002_v18 }
  0xd4   : > { %v401_v23 = vpop.f32.mrf.mxu0  ;;  %v441_v24 = vpop.f32.mrf.mxu1 }
  0xd5   : > { %v813_v25 = vpack.c.bf16 %v407_v21, %v407_v21  ;;  %v821_v26 = vpack.c.bf16 %v447_v22, %v447_v22  ;;  %v402_v27 = vadd.f32 %v1002_v18, %v401_v23  ;;  %v442_v28 = vadd.f32 %v1002_v18, %v441_v24 }
  0xd6   : > { %v855_v29 = vpop.f32.mrf.mxu0  ;;  %v867_v30 = vpop.f32.mrf.mxu1 }
  0xd7   : > { %546 = vst.msk [vmem:[%s1012_s6 + $0x4] sm:$0xf] %vm544_vm1, %v813_v25  ;;  %554 = vst.msk [vmem:[%s1012_s6 + $0x24] sm:$0xf] %vm544_vm1, %v821_v26  ;;  %v812_v31 = vpack.c.bf16 %v402_v27, %v402_v27  ;;  %v820_v32 = vpack.c.bf16 %v442_v28, %v442_v28  ;;  %v417_v33 = vadd.f32 %v855_v29, %v1002_v18  ;;  %579 = vrot.lane.b32.xlu1 %v821_v26, %s927_s7 }
  0xd8   : > { %563 = vrot.lane.b32.xlu0 %v813_v25, %s927_s7  ;;  %v411_v34 = vpop.f32.mrf.mxu0  ;;  %v457_v35 = vadd.f32 %v867_v30, %v1002_v18  ;;  %v451_v36 = vpop.f32.mrf.mxu1 }
  0xd9   : > { %545 = vst.msk [vmem:[%s1012_s6] sm:$0xf] %vm544_vm1, %v812_v31  ;;  %553 = vst.msk [vmem:[%s1012_s6 + $0x20] sm:$0xf] %vm544_vm1, %v820_v32  ;;  %v815_v37 = vpack.c.bf16 %v417_v33, %v417_v33  ;;  %v412_v38 = vadd.f32 %v1002_v18, %v411_v34  ;;  %v452_v39 = vadd.f32 %v1002_v18, %v451_v36 }
  0xda   : > { %v823_v40 = vpack.c.bf16 %v457_v35, %v457_v35  ;;  %v858_v41 = vpop.f32.mrf.mxu0  ;;  %v870_v42 = vpop.f32.mrf.mxu1 }
  0xdb   : > { %548 = vst.msk [vmem:[%s1012_s6 + $0xc] sm:$0xf] %vm544_vm1, %v815_v37  ;;  %v814_v43 = vpack.c.bf16 %v412_v38, %v412_v38  ;;  %v822_v44 = vpack.c.bf16 %v452_v39, %v452_v39  ;;  %567 = vrot.lane.b32.xlu1 %v815_v37, %s927_s7  ;;  %v427_v45 = vadd.f32 %v858_v41, %v1002_v18 }
  0xdc   : > { %561 = vrot.lane.b32.xlu0 %v812_v31, %s927_s7  ;;  %556 = vst.msk [vmem:[%s1012_s6 + $0x2c] sm:$0xf] %vm544_vm1, %v823_v40  ;;  %v421_v46 = vpop.f32.mrf.mxu0  ;;  %v467_v47 = vadd.f32 %v870_v42, %v1002_v18  ;;  %v461_v48 = vpop.f32.mrf.mxu1 }
  0xdd   : > { %547 = vst.msk [vmem:[%s1012_s6 + $0x8] sm:$0xf] %vm544_vm1, %v814_v43  ;;  %555 = vst.msk [vmem:[%s1012_s6 + $0x28] sm:$0xf] %vm544_vm1, %v822_v44  ;;  %v817_v49 = vpack.c.bf16 %v427_v45, %v427_v45  ;;  %v422_v50 = vadd.f32 %v1002_v18, %v421_v46  ;;  %v462_v51 = vadd.f32 %v1002_v18, %v461_v48 }
  0xde   : > { %v825_v52 = vpack.c.bf16 %v467_v47, %v467_v47  ;;  %v861_v53 = vpop.f32.mrf.mxu0  ;;  %v873_v54 = vpop.f32.mrf.mxu1 }
  0xdf   : > { %550 = vst.msk [vmem:[%s1012_s6 + $0x14] sm:$0xf] %vm544_vm1, %v817_v49  ;;  %583 = vrot.lane.b32.xlu1 %v823_v40, %s927_s7  ;;  %v816_v55 = vpack.c.bf16 %v422_v50, %v422_v50  ;;  %v824_v56 = vpack.c.bf16 %v462_v51, %v462_v51  ;;  %v437_v57 = vadd.f32 %v861_v53, %v1002_v18 }
  0xe0   : > { %577 = vrot.lane.b32.xlu0 %v820_v32, %s927_s7  ;;  %558 = vst.msk [vmem:[%s1012_s6 + $0x34] sm:$0xf] %vm544_vm1, %v825_v52  ;;  %v431_v58 = vpop.f32.mrf.mxu0  ;;  %v477_v59 = vadd.f32 %v873_v54, %v1002_v18  ;;  %v471_v60 = vpop.f32.mrf.mxu1 }
  0xe1   : > { %549 = vst.msk [vmem:[%s1012_s6 + $0x10] sm:$0xf] %vm544_vm1, %v816_v55  ;;  %557 = vst.msk [vmem:[%s1012_s6 + $0x30] sm:$0xf] %vm544_vm1, %v824_v56  ;;  %v819_v61 = vpack.c.bf16 %v437_v57, %v437_v57  ;;  %v432_v62 = vadd.f32 %v1002_v18, %v431_v58  ;;  %v472_v63 = vadd.f32 %v1002_v18, %v471_v60 }
  0xe2   : > { %v827_v0 = vpack.c.bf16 %v477_v59, %v477_v59 }
  0xe3   : > { %565 = vrot.lane.b32.xlu1 %v814_v43, %s927_s7  ;;  %552 = vst.msk [vmem:[%s1012_s6 + $0x1c] sm:$0xf] %vm544_vm1, %v819_v61  ;;  %v818_v1 = vpack.c.bf16 %v432_v62, %v432_v62  ;;  %v826_v2 = vpack.c.bf16 %v472_v63, %v472_v63 }
  0xe4   : > { %581 = vrot.lane.b32.xlu0 %v822_v44, %s927_s7  ;;  %560 = vst.msk [vmem:[%s1012_s6 + $0x3c] sm:$0xf] %vm544_vm1, %v827_v0 }
  0xe5   : > { %551 = vst.msk [vmem:[%s1012_s6 + $0x18] sm:$0xf] %vm544_vm1, %v818_v1  ;;  %559 = vst.msk [vmem:[%s1012_s6 + $0x38] sm:$0xf] %vm544_vm1, %v826_v2 }
  0xe7   : > { %571 = vrot.lane.b32.xlu1 %v817_v49, %s927_s7 }
  0xe8   : > { %569 = vrot.lane.b32.xlu0 %v816_v55, %s927_s7 }
  0xeb   : > { %587 = vrot.lane.b32.xlu1 %v825_v52, %s927_s7 }
  0xec   : > { %585 = vrot.lane.b32.xlu0 %v824_v56, %s927_s7 }
  0xef   : > { %575 = vrot.lane.b32.xlu1 %v819_v61, %s927_s7 }
  0xf0   : > { %573 = vrot.lane.b32.xlu0 %v818_v1, %s927_s7 }
  0xf3   : > { %591 = vrot.lane.b32.xlu1 %v827_v0, %s927_s7 }
  0xf4   : > { %589 = vrot.lane.b32.xlu0 %v826_v2, %s927_s7 }
 0x149   : > { %v580_v3 = vpop.permute.xlu1 %579 }
 0x14a   : > { %v564_v4 = vpop.permute.xlu0 %563  ;;  %619 = vst.msk [vmem:[%s1081_s10 + $0x24] sm:$0xf] %vm609_vm2, %v580_v3 }
 0x14b   : > { %611 = vst.msk [vmem:[%s1081_s10 + $0x4] sm:$0xf] %vm609_vm2, %v564_v4 }
 0x14d   : > { %v568_v5 = vpop.permute.xlu1 %567 }
 0x14e   : > { %v562_v6 = vpop.permute.xlu0 %561  ;;  %613 = vst.msk [vmem:[%s1081_s10 + $0xc] sm:$0xf] %vm609_vm2, %v568_v5 }
 0x14f   : > { %610 = vst.msk [vmem:[%s1081_s10] sm:$0xf] %vm609_vm2, %v562_v6 }
 0x151   : > { %v584_v7 = vpop.permute.xlu1 %583 }
 0x152   : > { %v578_v8 = vpop.permute.xlu0 %577  ;;  %621 = vst.msk [vmem:[%s1081_s10 + $0x2c] sm:$0xf] %vm609_vm2, %v584_v7 }
 0x153   : > { %618 = vst.msk [vmem:[%s1081_s10 + $0x20] sm:$0xf] %vm609_vm2, %v578_v8 }
 0x155   : > { %v566_v9 = vpop.permute.xlu1 %565 }
 0x156   : > { %v582_v10 = vpop.permute.xlu0 %581  ;;  %612 = vst.msk [vmem:[%s1081_s10 + $0x8] sm:$0xf] %vm609_vm2, %v566_v9 }
 0x157   : > { %620 = vst.msk [vmem:[%s1081_s10 + $0x28] sm:$0xf] %vm609_vm2, %v582_v10 }
 0x159   : > { %v572_v11 = vpop.permute.xlu1 %571 }
 0x15a   : > { %v570_v12 = vpop.permute.xlu0 %569  ;;  %615 = vst.msk [vmem:[%s1081_s10 + $0x14] sm:$0xf] %vm609_vm2, %v572_v11 }
 0x15b   : > { %614 = vst.msk [vmem:[%s1081_s10 + $0x10] sm:$0xf] %vm609_vm2, %v570_v12 }
 0x15d   : > { %v588_v13 = vpop.permute.xlu1 %587 }
 0x15e   : > { %v586_v14 = vpop.permute.xlu0 %585  ;;  %623 = vst.msk [vmem:[%s1081_s10 + $0x34] sm:$0xf] %vm609_vm2, %v588_v13 }
 0x15f   : > { %622 = vst.msk [vmem:[%s1081_s10 + $0x30] sm:$0xf] %vm609_vm2, %v586_v14 }
 0x161   : > { %v576_v15 = vpop.permute.xlu1 %575 }
 0x162   : > { %v574_v16 = vpop.permute.xlu0 %573  ;;  %617 = vst.msk [vmem:[%s1081_s10 + $0x1c] sm:$0xf] %vm609_vm2, %v576_v15 }
 0x163   : > { %616 = vst.msk [vmem:[%s1081_s10 + $0x18] sm:$0xf] %vm609_vm2, %v574_v16 }
 0x165   : > { %v592_v17 = vpop.permute.xlu1 %591 }
 0x166   : > { %v590_v18 = vpop.permute.xlu0 %589  ;;  %625 = vst.msk [vmem:[%s1081_s10 + $0x3c] sm:$0xf] %vm609_vm2, %v592_v17 }
 0x167   : > { %624 = vst.msk [vmem:[%s1081_s10 + $0x38] sm:$0xf] %vm609_vm2, %v590_v18 }
 0x168 PF: > { %s15_s17 = sadd.s32 1, %s925_s17   ;;  %s1129_s15 = smov %s921_s16 }
 0x169   : > { %p12_p5 = scmp.ge.s32.totalorder %s15_s17, 4   ;;  %s1130_s16 = smov %s1132_s18 }
 0x16b   :  { %14 = sbr.rel (!%p12_p5) target bundleno = 2 (0x2), region = 74 }

</bundles_post_ra>
